<compile_context>
chip_gen: v7x
topology: tpu7x:2x2x1
jax: 0.10.0
libtpu: 0.0.40
codegen_flags: <defaults>
</compile_context>

<pallas_src>
import functools
import math

import jax
import jax.numpy as jnp
from jax import lax
from jax.experimental import pallas as pl
from jax.experimental.pallas import tpu as pltpu


# ---------------------------------------------------------------------------
# Stage 1: fused c_attn (Conv1D, rf=1) with head-major q/k/v staging.
# ---------------------------------------------------------------------------
def _qkv_head_kernel(x_ref, w_ref, b_ref, q_ref, k_ref, v_ref, *, head_dim, scale):
    """One (batch, seq-tile, head) step: [q|k|v]_h = x @ W[h] + b[h]."""
    x = x_ref[...].astype(jnp.bfloat16)                        # [ts, nx]
    w = w_ref[...]                                             # [nx, 3*D] bf16
    qkv = jnp.dot(x, w, preferred_element_type=jnp.float32)    # [ts, 3*D] f32 accum
    qkv = qkv + b_ref[...]                                     # bias in f32

    d = head_dim
    q = qkv[:, :d]
    if scale:
        q = q * (1.0 / math.sqrt(d))                           # fold 1/sqrt(D) into q
    q_ref[...] = q.astype(q_ref.dtype)
    k_ref[...] = qkv[:, d:2 * d].astype(k_ref.dtype)
    v_ref[...] = qkv[:, 2 * d:3 * d].astype(v_ref.dtype)


# ---------------------------------------------------------------------------
# Stage 2: flash-style causal attention + merge_heads + c_proj, fused.
# ---------------------------------------------------------------------------
def _flash_attn_proj_kernel(q_ref, k_ref, v_ref, wp_ref, bp_ref, o_ref,
                            m_scr, l_scr, acc_scr, *, n_head, tile):
    qi = pl.program_id(1)          # query-tile index
    ki = pl.program_id(2)          # kv-tile index (reduction axis)

    @pl.when(ki == 0)
    def _init():
        m_scr[...] = jnp.full_like(m_scr, -jnp.inf)
        l_scr[...] = jnp.zeros_like(l_scr)
        acc_scr[...] = jnp.zeros_like(acc_scr)

    @pl.when(ki <= qi)             # skip KV tiles entirely above the causal diagonal
    def _step():
        # Additive causal mask for this (q-tile, kv-tile) pair, shared by all heads
        # (equivalent post-softmax to the reference's  w*tril + -1e9*(1-tril)).
        row = qi * tile + lax.broadcasted_iota(jnp.int32, (tile, tile), 0)
        col = ki * tile + lax.broadcasted_iota(jnp.int32, (tile, tile), 1)
        mask = jnp.where(col <= row, 0.0, -1e9).astype(jnp.float32)

        def head_body(h, carry):
            q_h = q_ref[h]          # [tq, D] bf16 (scale already folded in)
            k_h = k_ref[h]          # [tk, D] bf16
            v_h = v_ref[h]          # [tk, D] bf16
            # q @ k^T via transposed contraction (no data transpose), f32 accum.
            s = lax.dot_general(q_h, k_h, (((1,), (1,)), ((), ())),
                                preferred_element_type=jnp.float32)      # [tq, tk]
            s = s + mask
            m_prev = m_scr[h]                                            # [tq, 1]
            m_new = jnp.maximum(m_prev, jnp.max(s, axis=-1, keepdims=True))
            alpha = jnp.exp(m_prev - m_new)
            p = jnp.exp(s - m_new)
            # TODO(synk): attn_dropout is identity in eval mode (not implemented)
            l_scr[h] = alpha * l_scr[h] + jnp.sum(p, axis=-1, keepdims=True)
            acc_scr[h] = alpha * acc_scr[h] + jnp.dot(
                p.astype(jnp.bfloat16), v_h, preferred_element_type=jnp.float32)
            m_scr[h] = m_new
            return carry

        lax.fori_loop(0, n_head, head_body, 0)

    @pl.when(ki == qi)             # diagonal tile == last contributing KV tile
    def _finalize():
        # merge_heads, then ONE K=nx c_proj matmul (full MXU depth).
        parts = []
        for h in range(n_head):    # static: runs once per q tile, tiny temporaries
            inv_l = pl.reciprocal(l_scr[h], approx=True)                 # EUP recip
            parts.append((acc_scr[h] * inv_l).astype(jnp.bfloat16))
        a = jnp.concatenate(parts, axis=-1)                              # [tq, nx]
        out = jnp.dot(a, wp_ref[...], preferred_element_type=jnp.float32)
        # TODO(synk): resid_dropout is identity in eval mode (not implemented)
        o_ref[...] = (out + bp_ref[...]).astype(o_ref.dtype)


@functools.partial(jax.jit, static_argnames=("n_head", "scale", "seq_tile"))
def attention_forward(x, w_attn, b_attn, w_proj, b_proj, *, n_head, scale=False,
                      seq_tile=128):
    """x: [B,S,nx]; w_attn: [nx,3nx]; b_attn: [3nx]; w_proj: [nx,nx]; b_proj: [nx]."""
    B, S, nx = x.shape
    assert nx % n_head == 0
    d = nx // n_head
    assert w_attn.shape == (nx, 3 * nx) and w_proj.shape == (nx, nx)

    t = min(seq_tile, S)
    assert S % t == 0 and (t % 8 == 0 or t == S), "seq tile must divide S, multiple of 8"
    n_tiles = S // t

    # Wrapper-side layout plumbing only (no compute hoisted): head-major bf16 weights.
    # w_attn columns are [q | k | v], each already head-contiguous -> pure reshape.
    w_qkv = (w_attn.reshape(nx, 3, n_head, d).transpose(2, 0, 1, 3)
             .reshape(n_head, nx, 3 * d).astype(jnp.bfloat16))
    b_qkv = (b_attn.reshape(3, n_head, d).transpose(1, 0, 2)
             .reshape(n_head, 1, 3 * d).astype(jnp.float32))

    qkv_shape = jax.ShapeDtypeStruct((B, n_head, S, d), jnp.bfloat16)
    q_hm, k_hm, v_hm = pl.pallas_call(
        functools.partial(_qkv_head_kernel, head_dim=d, scale=bool(scale)),
        out_shape=(qkv_shape, qkv_shape, qkv_shape),
        grid_spec=pltpu.PrefetchScalarGridSpec(
            num_scalar_prefetch=0,
            grid=(B, n_tiles, n_head),     # head innermost: x block index unchanged -> no re-fetch
            in_specs=[
                pl.BlockSpec((None, t, nx), lambda b, s, h: (b, s, 0)),
                pl.BlockSpec((None, nx, 3 * d), lambda b, s, h: (h, 0, 0)),
                pl.BlockSpec((None, 1, 3 * d), lambda b, s, h: (h, 0, 0)),
            ],
            out_specs=(
                pl.BlockSpec((None, None, t, d), lambda b, s, h: (b, h, s, 0)),
                pl.BlockSpec((None, None, t, d), lambda b, s, h: (b, h, s, 0)),
                pl.BlockSpec((None, None, t, d), lambda b, s, h: (b, h, s, 0)),
            ),
        ),
        compiler_params=pltpu.CompilerParams(
            dimension_semantics=("parallel", "parallel", "arbitrary"),
            vmem_limit_bytes=32 * 1024 * 1024,
        ),
    )(x, w_qkv, b_qkv)

    # TODO(synk): pipeline_mode=pl.Buffered(1) on the grid-invariant w_proj/b_proj specs
    # would save one weight buffer of VMEM; left at the default for portability.
    out = pl.pallas_call(
        functools.partial(_flash_attn_proj_kernel, n_head=n_head, tile=t),
        out_shape=jax.ShapeDtypeStruct((B, S, nx), x.dtype),
        grid_spec=pltpu.PrefetchScalarGridSpec(
            num_scalar_prefetch=0,
            grid=(B, n_tiles, n_tiles),    # (batch, q-tile, kv-tile); kv is the reduction
            in_specs=[
                pl.BlockSpec((None, n_head, t, d), lambda b, q, k: (b, 0, q, 0)),
                # Clamp the kv block index for fully-masked (skipped) tiles so no
                # redundant DMA is even issued for them.
                pl.BlockSpec((None, n_head, t, d),
                             lambda b, q, k: (b, 0, jnp.minimum(k, q), 0)),
                pl.BlockSpec((None, n_head, t, d),
                             lambda b, q, k: (b, 0, jnp.minimum(k, q), 0)),
                pl.BlockSpec((nx, nx), lambda b, q, k: (0, 0)),      # w_proj (bf16, invariant)
                pl.BlockSpec((1, nx), lambda b, q, k: (0, 0)),       # b_proj
            ],
            out_specs=pl.BlockSpec((None, t, nx), lambda b, q, k: (b, q, 0)),
            scratch_shapes=[
                pltpu.VMEM((n_head, t, 1), jnp.float32),   # running max  m
                pltpu.VMEM((n_head, t, 1), jnp.float32),   # running sum  l
                pltpu.VMEM((n_head, t, d), jnp.float32),   # running acc  (p @ v)
            ],
        ),
        compiler_params=pltpu.CompilerParams(
            dimension_semantics=("parallel", "parallel", "arbitrary"),
            vmem_limit_bytes=32 * 1024 * 1024,
        ),
    )(q_hm, k_hm, v_hm, w_proj.astype(jnp.bfloat16),
      b_proj.reshape(1, nx).astype(jnp.float32))
    return out


def _attention_reference(x, w_attn, b_attn, w_proj, b_proj, n_head, scale):
    """Pure-JAX f32 mirror of the PyTorch Attention.forward (eval mode)."""
    B, S, nx = x.shape
    D = nx // n_head
    qkv = x.reshape(-1, nx) @ w_attn + b_attn
    qkv = qkv.reshape(B, S, 3 * nx)
    q, k, v = jnp.split(qkv, 3, axis=2)

    def split_heads(tn, k_mode=False):
        tn = tn.reshape(B, S, n_head, D)
        return tn.transpose(0, 2, 3, 1) if k_mode else tn.transpose(0, 2, 1, 3)

    qh, kh, vh = split_heads(q), split_heads(k, True), split_heads(v)
    w = jnp.matmul(qh, kh)                                    # [B, H, S, S]
    if scale:
        w = w / math.sqrt(D)
    b = jnp.tril(jnp.ones((S, S), dtype=w.dtype))
    w = w * b + (-1e9) * (1.0 - b)
    p = jax.nn.softmax(w, axis=-1)
    a = jnp.matmul(p, vh)                                     # [B, H, S, D]
    a = a.transpose(0, 2, 1, 3).reshape(B, S, nx)
    out = a.reshape(-1, nx) @ w_proj + b_proj
    return out.reshape(B, S, nx)


if __name__ == "__main__":
    # Small shapes: batch=2, seq=16, n_embd=32, n_head=4, seq tile=8 so the test
    # exercises 2 q-tiles x 2 kv-tiles (online softmax across tiles, causal skip,
    # diagonal-tile masking).
    B, S, NX, NH, TILE = 2, 16, 32, 4, 8

    key = jax.random.PRNGKey(0)
    kx, kwa, kba, kwp, kbp = jax.random.split(key, 5)
    x = jax.random.normal(kx, (B, S, NX), dtype=jnp.float32)
    w_attn = jax.random.normal(kwa, (NX, 3 * NX), dtype=jnp.float32) * 0.02
    b_attn = jax.random.normal(kba, (3 * NX,), dtype=jnp.float32) * 0.02
    w_proj = jax.random.normal(kwp, (NX, NX), dtype=jnp.float32) * 0.02
    b_proj = jax.random.normal(kbp, (NX,), dtype=jnp.float32) * 0.02

    for scale in (True, False):
        out = attention_forward(x, w_attn, b_attn, w_proj, b_proj,
                                n_head=NH, scale=scale, seq_tile=TILE)
        jax.block_until_ready(out)
        ref = _attention_reference(x, w_attn, b_attn, w_proj, b_proj, NH, scale)
        assert out.shape == (B, S, NX)
        err = float(jnp.max(jnp.abs(out - ref)))
        # bf16 MXU operands + approx reciprocal -> relaxed (but still tight) tolerance.
        assert jnp.allclose(out, ref, atol=5e-3, rtol=1e-2), err

    print("KERNEL_OK")
</pallas_src>

<mosaic_0001>
module attributes {stable_mosaic.version = 11 : i64} {
  func.func @_qkv_head_kernel(%arg0: i32, %arg1: i32, %arg2: i32, %arg3: memref<1x8x32xf32, #tpu.memory_space<vmem>>, %arg4: memref<1x32x24xbf16, #tpu.memory_space<vmem>>, %arg5: memref<1x1x24xf32, #tpu.memory_space<vmem>>, %arg6: memref<1x1x8x8xbf16, #tpu.memory_space<vmem>>, %arg7: memref<1x1x8x8xbf16, #tpu.memory_space<vmem>>, %arg8: memref<1x1x8x8xbf16, #tpu.memory_space<vmem>>) attributes {dimension_semantics = [#tpu.dimension_semantics<parallel>, #tpu.dimension_semantics<parallel>, #tpu.dimension_semantics<arbitrary>], iteration_bounds = array<i64: 2, 2, 4>, scalar_prefetch = 0 : i64, scratch_operands = 0 : i64, tpu.core_type = #tpu.core_type<tc>, window_params = [{transform_indices = @transform_0, window_bounds = array<i64: 1, 8, 32>}, {transform_indices = @transform_1, window_bounds = array<i64: 1, 32, 24>}, {transform_indices = @transform_2, window_bounds = array<i64: 1, 1, 24>}, {transform_indices = @transform_3, window_bounds = array<i64: 1, 1, 8, 8>}, {transform_indices = @transform_4, window_bounds = array<i64: 1, 1, 8, 8>}, {transform_indices = @transform_5, window_bounds = array<i64: 1, 1, 8, 8>}]} {
    %c0 = arith.constant 0 : index
    %c0_0 = arith.constant 0 : index
    %c0_1 = arith.constant 0 : index
    %0 = vector.load %arg3[%c0, %c0_0, %c0_1] : memref<1x8x32xf32, #tpu.memory_space<vmem>>, vector<1x8x32xf32>
    %1 = vector.shape_cast %0 : vector<1x8x32xf32> to vector<8x32xf32>
    %2 = arith.truncf %1 : vector<8x32xf32> to vector<8x32xbf16>
    %c0_2 = arith.constant 0 : index
    %c0_3 = arith.constant 0 : index
    %c0_4 = arith.constant 0 : index
    %3 = vector.load %arg4[%c0_2, %c0_3, %c0_4] : memref<1x32x24xbf16, #tpu.memory_space<vmem>>, vector<1x32x24xbf16>
    %4 = vector.shape_cast %3 : vector<1x32x24xbf16> to vector<32x24xbf16>
    %cst = arith.constant dense<0.000000e+00> : vector<8x24xf32>
    %5 = tpu.matmul %2, %4, %cst {dimension_numbers = #tpu.dot_dimension_numbers<[1], [0], [0], [1], [0, 0, 1, 1], [], []>} : vector<8x32xbf16>, vector<32x24xbf16>, vector<8x24xf32> -> vector<8x24xf32>
    %c0_5 = arith.constant 0 : index
    %c0_6 = arith.constant 0 : index
    %c0_7 = arith.constant 0 : index
    %6 = vector.load %arg5[%c0_5, %c0_6, %c0_7] : memref<1x1x24xf32, #tpu.memory_space<vmem>>, vector<1x1x24xf32>
    %7 = vector.shape_cast %6 : vector<1x1x24xf32> to vector<1x24xf32>
    %8 = vector.broadcast %7 : vector<1x24xf32> to vector<8x24xf32>
    %9 = arith.addf %5, %8 : vector<8x24xf32>
    %10 = vector.extract_strided_slice %9 {offsets = [0, 0], sizes = [8, 8], strides = [1, 1]} : vector<8x24xf32> to vector<8x8xf32>
    %cst_8 = arith.constant 0.353553385 : f32
    %11 = vector.broadcast %cst_8 : f32 to vector<8x8xf32>
    %12 = arith.mulf %10, %11 : vector<8x8xf32>
    %13 = arith.truncf %12 : vector<8x8xf32> to vector<8x8xbf16>
    %c0_9 = arith.constant 0 : index
    %c0_10 = arith.constant 0 : index
    %c0_11 = arith.constant 0 : index
    %c0_12 = arith.constant 0 : index
    %14 = vector.load %arg6[%c0_9, %c0_10, %c0_11, %c0_12] : memref<1x1x8x8xbf16, #tpu.memory_space<vmem>>, vector<1x1x8x8xbf16>
    %15 = vector.shape_cast %14 : vector<1x1x8x8xbf16> to vector<8x8xbf16>
    %16 = vector.shape_cast %13 : vector<8x8xbf16> to vector<1x1x8x8xbf16>
    tpu.vector_store %arg6[%c0_9, %c0_10, %c0_11, %c0_12], %16 {strides = array<i32>} : memref<1x1x8x8xbf16, #tpu.memory_space<vmem>>, vector<1x1x8x8xbf16>,
    %17 = vector.extract_strided_slice %9 {offsets = [0, 8], sizes = [8, 8], strides = [1, 1]} : vector<8x24xf32> to vector<8x8xf32>
    %18 = arith.truncf %17 : vector<8x8xf32> to vector<8x8xbf16>
    %c0_13 = arith.constant 0 : index
    %c0_14 = arith.constant 0 : index
    %c0_15 = arith.constant 0 : index
    %c0_16 = arith.constant 0 : index
    %19 = vector.load %arg7[%c0_13, %c0_14, %c0_15, %c0_16] : memref<1x1x8x8xbf16, #tpu.memory_space<vmem>>, vector<1x1x8x8xbf16>
    %20 = vector.shape_cast %19 : vector<1x1x8x8xbf16> to vector<8x8xbf16>
    %21 = vector.shape_cast %18 : vector<8x8xbf16> to vector<1x1x8x8xbf16>
    tpu.vector_store %arg7[%c0_13, %c0_14, %c0_15, %c0_16], %21 {strides = array<i32>} : memref<1x1x8x8xbf16, #tpu.memory_space<vmem>>, vector<1x1x8x8xbf16>,
    %22 = vector.extract_strided_slice %9 {offsets = [0, 16], sizes = [8, 8], strides = [1, 1]} : vector<8x24xf32> to vector<8x8xf32>
    %23 = arith.truncf %22 : vector<8x8xf32> to vector<8x8xbf16>
    %c0_17 = arith.constant 0 : index
    %c0_18 = arith.constant 0 : index
    %c0_19 = arith.constant 0 : index
    %c0_20 = arith.constant 0 : index
    %24 = vector.load %arg8[%c0_17, %c0_18, %c0_19, %c0_20] : memref<1x1x8x8xbf16, #tpu.memory_space<vmem>>, vector<1x1x8x8xbf16>
    %25 = vector.shape_cast %24 : vector<1x1x8x8xbf16> to vector<8x8xbf16>
    %26 = vector.shape_cast %23 : vector<8x8xbf16> to vector<1x1x8x8xbf16>
    tpu.vector_store %arg8[%c0_17, %c0_18, %c0_19, %c0_20], %26 {strides = array<i32>} : memref<1x1x8x8xbf16, #tpu.memory_space<vmem>>, vector<1x1x8x8xbf16>,
    return
  }
  func.func @transform_0(%arg0: i32, %arg1: i32, %arg2: i32) -> (i32, i32, i32) {
    %c0_i32 = arith.constant 0 : i32
    %c0_i32_0 = arith.constant 0 : i32
    return %arg0, %arg1, %c0_i32 : i32, i32, i32
  }
  func.func @transform_1(%arg0: i32, %arg1: i32, %arg2: i32) -> (i32, i32, i32) {
    %c0_i32 = arith.constant 0 : i32
    %c0_i32_0 = arith.constant 0 : i32
    %c0_i32_1 = arith.constant 0 : i32
    return %arg2, %c0_i32, %c0_i32_0 : i32, i32, i32
  }
  func.func @transform_2(%arg0: i32, %arg1: i32, %arg2: i32) -> (i32, i32, i32) {
    %c0_i32 = arith.constant 0 : i32
    %c0_i32_0 = arith.constant 0 : i32
    %c0_i32_1 = arith.constant 0 : i32
    return %arg2, %c0_i32, %c0_i32_0 : i32, i32, i32
  }
  func.func @transform_3(%arg0: i32, %arg1: i32, %arg2: i32) -> (i32, i32, i32, i32) {
    %c0_i32 = arith.constant 0 : i32
    %c0_i32_0 = arith.constant 0 : i32
    return %arg0, %arg2, %arg1, %c0_i32 : i32, i32, i32, i32
  }
  func.func @transform_4(%arg0: i32, %arg1: i32, %arg2: i32) -> (i32, i32, i32, i32) {
    %c0_i32 = arith.constant 0 : i32
    %c0_i32_0 = arith.constant 0 : i32
    return %arg0, %arg2, %arg1, %c0_i32 : i32, i32, i32, i32
  }
  func.func @transform_5(%arg0: i32, %arg1: i32, %arg2: i32) -> (i32, i32, i32, i32) {
    %c0_i32 = arith.constant 0 : i32
    %c0_i32_0 = arith.constant 0 : i32
    return %arg0, %arg2, %arg1, %c0_i32 : i32, i32, i32, i32
  }
}

module attributes {stable_mosaic.version = 11 : i64} {
  func.func @_flash_attn_proj_kernel(%arg0: i32, %arg1: i32, %arg2: i32, %arg3: memref<1x4x8x8xbf16, #tpu.memory_space<vmem>>, %arg4: memref<1x4x8x8xbf16, #tpu.memory_space<vmem>>, %arg5: memref<1x4x8x8xbf16, #tpu.memory_space<vmem>>, %arg6: memref<32x32xbf16, #tpu.memory_space<vmem>>, %arg7: memref<1x32xf32, #tpu.memory_space<vmem>>, %arg8: memref<1x8x32xf32, #tpu.memory_space<vmem>>, %arg9: memref<4x8x1xf32, #tpu.memory_space<vmem>>, %arg10: memref<4x8x1xf32, #tpu.memory_space<vmem>>, %arg11: memref<4x8x8xf32, #tpu.memory_space<vmem>>) attributes {dimension_semantics = [#tpu.dimension_semantics<parallel>, #tpu.dimension_semantics<parallel>, #tpu.dimension_semantics<arbitrary>], iteration_bounds = array<i64: 2, 2, 2>, scalar_prefetch = 0 : i64, scratch_operands = 3 : i64, tpu.core_type = #tpu.core_type<tc>, window_params = [{transform_indices = @transform_0, window_bounds = array<i64: 1, 4, 8, 8>}, {transform_indices = @transform_1, window_bounds = array<i64: 1, 4, 8, 8>}, {transform_indices = @transform_2, window_bounds = array<i64: 1, 4, 8, 8>}, {pipeline_mode = #tpu.pipeline_mode<synchronous>, transform_indices = @transform_3, window_bounds = array<i64: 32, 32>}, {pipeline_mode = #tpu.pipeline_mode<synchronous>, transform_indices = @transform_4, window_bounds = array<i64: 1, 32>}, {transform_indices = @transform_5, window_bounds = array<i64: 1, 8, 32>}]} {
    %c0_i32 = arith.constant 0 : i32
    %0 = arith.cmpi eq, %arg2, %c0_i32 : i32
    %1 = arith.extui %0 : i1 to i32
    %c0_i32_0 = arith.constant 0 : i32
    %2 = arith.cmpi ne, %1, %c0_i32_0 : i32
    scf.if %2 {
      %cst = arith.constant 0xFF800000 : f32
      %9 = vector.broadcast %cst : f32 to vector<4x8x1xf32>
      %c0 = arith.constant 0 : index
      %c0_3 = arith.constant 0 : index
      %c0_4 = arith.constant 0 : index
      %10 = vector.load %arg9[%c0, %c0_3, %c0_4] : memref<4x8x1xf32, #tpu.memory_space<vmem>>, vector<4x8x1xf32>
      tpu.vector_store %arg9[%c0, %c0_3, %c0_4], %9 {strides = array<i32>} : memref<4x8x1xf32, #tpu.memory_space<vmem>>, vector<4x8x1xf32>,
      %cst_5 = arith.constant 0.000000e+00 : f32
      %11 = vector.broadcast %cst_5 : f32 to vector<4x8x1xf32>
      %c0_6 = arith.constant 0 : index
      %c0_7 = arith.constant 0 : index
      %c0_8 = arith.constant 0 : index
      %12 = vector.load %arg10[%c0_6, %c0_7, %c0_8] : memref<4x8x1xf32, #tpu.memory_space<vmem>>, vector<4x8x1xf32>
      tpu.vector_store %arg10[%c0_6, %c0_7, %c0_8], %11 {strides = array<i32>} : memref<4x8x1xf32, #tpu.memory_space<vmem>>, vector<4x8x1xf32>,
      %cst_9 = arith.constant 0.000000e+00 : f32
      %13 = vector.broadcast %cst_9 : f32 to vector<4x8x8xf32>
      %c0_10 = arith.constant 0 : index
      %c0_11 = arith.constant 0 : index
      %c0_12 = arith.constant 0 : index
      %14 = vector.load %arg11[%c0_10, %c0_11, %c0_12] : memref<4x8x8xf32, #tpu.memory_space<vmem>>, vector<4x8x8xf32>
      tpu.vector_store %arg11[%c0_10, %c0_11, %c0_12], %13 {strides = array<i32>} : memref<4x8x8xf32, #tpu.memory_space<vmem>>, vector<4x8x8xf32>,
    } else {
    }
    %3 = arith.cmpi sle, %arg2, %arg1 : i32
    %4 = arith.extui %3 : i1 to i32
    %c0_i32_1 = arith.constant 0 : i32
    %5 = arith.cmpi ne, %4, %c0_i32_1 : i32
    scf.if %5 {
      %c8_i32 = arith.constant 8 : i32
      %9 = arith.muli %arg1, %c8_i32 : i32
      %10 = tpu.iota {dimensions = array<i32: 0>} : vector<8x8xi32>
      %11 = vector.broadcast %9 : i32 to vector<8x8xi32>
      %12 = arith.addi %11, %10 : vector<8x8xi32>
      %c8_i32_3 = arith.constant 8 : i32
      %13 = arith.muli %arg2, %c8_i32_3 : i32
      %14 = tpu.iota {dimensions = array<i32: 1>} : vector<8x8xi32>
      %15 = vector.broadcast %13 : i32 to vector<8x8xi32>
      %16 = arith.addi %15, %14 : vector<8x8xi32>
      %17 = arith.cmpi sle, %16, %12 : vector<8x8xi32>
      %cst = arith.constant 0.000000e+00 : f32
      %cst_4 = arith.constant -1.000000e+09 : f32
      %18 = vector.broadcast %cst : f32 to vector<8x8xf32>
      %19 = vector.broadcast %cst_4 : f32 to vector<8x8xf32>
      %20 = arith.select %17, %18, %19 : vector<8x8xi1>, vector<8x8xf32>
      %c0_i32_5 = arith.constant 0 : i32
      %c4_i32 = arith.constant 4 : i32
      %21 = arith.addi %c0_i32_5, %c4_i32 : i32
      %c1_i32 = arith.constant 1 : i32
      scf.for %arg12 = %c0_i32_5 to %21 step %c1_i32  : i32 {
        %c0 = arith.constant 0 : index
        %22 = arith.index_cast %arg12 : i32 to index
        %c0_7 = arith.constant 0 : index
        %c0_8 = arith.constant 0 : index
        %23 = vector.load %arg3[%c0, %22, %c0_7, %c0_8] : memref<1x4x8x8xbf16, #tpu.memory_space<vmem>>, vector<1x1x8x8xbf16>
        %24 = vector.shape_cast %23 : vector<1x1x8x8xbf16> to vector<8x8xbf16>
        %c0_9 = arith.constant 0 : index
        %25 = arith.index_cast %arg12 : i32 to index
        %c0_10 = arith.constant 0 : index
        %c0_11 = arith.constant 0 : index
        %26 = vector.load %arg4[%c0_9, %25, %c0_10, %c0_11] : memref<1x4x8x8xbf16, #tpu.memory_space<vmem>>, vector<1x1x8x8xbf16>
        %27 = vector.shape_cast %26 : vector<1x1x8x8xbf16> to vector<8x8xbf16>
        %c0_12 = arith.constant 0 : index
        %28 = arith.index_cast %arg12 : i32 to index
        %c0_13 = arith.constant 0 : index
        %c0_14 = arith.constant 0 : index
        %29 = vector.load %arg5[%c0_12, %28, %c0_13, %c0_14] : memref<1x4x8x8xbf16, #tpu.memory_space<vmem>>, vector<1x1x8x8xbf16>
        %30 = vector.shape_cast %29 : vector<1x1x8x8xbf16> to vector<8x8xbf16>
        %cst_15 = arith.constant dense<0.000000e+00> : vector<8x8xf32>
        %31 = tpu.matmul %24, %27, %cst_15 {dimension_numbers = #tpu.dot_dimension_numbers<[1], [1], [0], [0], [0, 0, 1, 0], [], []>} : vector<8x8xbf16>, vector<8x8xbf16>, vector<8x8xf32> -> vector<8x8xf32>
        %32 = arith.addf %31, %20 : vector<8x8xf32>
        %33 = arith.index_cast %arg12 : i32 to index
        %c0_16 = arith.constant 0 : index
        %c0_17 = arith.constant 0 : index
        %34 = vector.load %arg9[%33, %c0_16, %c0_17] : memref<4x8x1xf32, #tpu.memory_space<vmem>>, vector<1x8x1xf32>
        %35 = vector.shape_cast %34 : vector<1x8x1xf32> to vector<8x1xf32>
        %cst_18 = arith.constant dense<0xFF800000> : vector<8xf32>
        %36 = vector.multi_reduction <maximumf>, %32, %cst_18 [1] : vector<8x8xf32> to vector<8xf32>
        %37 = vector.shape_cast %36 : vector<8xf32> to vector<8x1xf32>
        %38 = arith.maximumf %35, %37 : vector<8x1xf32>
        %39 = arith.subf %35, %38 : vector<8x1xf32>
        %40 = math.exp %39 : vector<8x1xf32>
        %41 = vector.broadcast %38 : vector<8x1xf32> to vector<8x8xf32>
        %42 = arith.subf %32, %41 : vector<8x8xf32>
        %43 = math.exp %42 : vector<8x8xf32>
        %44 = arith.index_cast %arg12 : i32 to index
        %c0_19 = arith.constant 0 : index
        %c0_20 = arith.constant 0 : index
        %45 = vector.load %arg10[%44, %c0_19, %c0_20] : memref<4x8x1xf32, #tpu.memory_space<vmem>>, vector<1x8x1xf32>
        %46 = vector.shape_cast %45 : vector<1x8x1xf32> to vector<8x1xf32>
        %47 = arith.mulf %40, %46 : vector<8x1xf32>
        %cst_21 = arith.constant dense<0.000000e+00> : vector<8xf32>
        %48 = vector.multi_reduction <add>, %43, %cst_21 [1] : vector<8x8xf32> to vector<8xf32>
        %49 = vector.shape_cast %48 : vector<8xf32> to vector<8x1xf32>
        %50 = arith.addf %47, %49 : vector<8x1xf32>
        %51 = arith.index_cast %arg12 : i32 to index
        %c0_22 = arith.constant 0 : index
        %c0_23 = arith.constant 0 : index
        %52 = vector.load %arg10[%51, %c0_22, %c0_23] : memref<4x8x1xf32, #tpu.memory_space<vmem>>, vector<1x8x1xf32>
        %53 = vector.shape_cast %52 : vector<1x8x1xf32> to vector<8x1xf32>
        %54 = vector.shape_cast %50 : vector<8x1xf32> to vector<1x8x1xf32>
        tpu.vector_store %arg10[%51, %c0_22, %c0_23], %54 {strides = array<i32>} : memref<4x8x1xf32, #tpu.memory_space<vmem>>, vector<1x8x1xf32>,
        %55 = arith.index_cast %arg12 : i32 to index
        %c0_24 = arith.constant 0 : index
        %c0_25 = arith.constant 0 : index
        %56 = vector.load %arg11[%55, %c0_24, %c0_25] : memref<4x8x8xf32, #tpu.memory_space<vmem>>, vector<1x8x8xf32>
        %57 = vector.shape_cast %56 : vector<1x8x8xf32> to vector<8x8xf32>
        %58 = vector.broadcast %40 : vector<8x1xf32> to vector<8x8xf32>
        %59 = arith.mulf %58, %57 : vector<8x8xf32>
        %60 = arith.truncf %43 : vector<8x8xf32> to vector<8x8xbf16>
        %cst_26 = arith.constant dense<0.000000e+00> : vector<8x8xf32>
        %61 = tpu.matmul %60, %30, %cst_26 {dimension_numbers = #tpu.dot_dimension_numbers<[1], [0], [0], [1], [0, 0, 1, 1], [], []>} : vector<8x8xbf16>, vector<8x8xbf16>, vector<8x8xf32> -> vector<8x8xf32>
        %62 = arith.addf %59, %61 : vector<8x8xf32>
        %63 = arith.index_cast %arg12 : i32 to index
        %c0_27 = arith.constant 0 : index
        %c0_28 = arith.constant 0 : index
        %64 = vector.load %arg11[%63, %c0_27, %c0_28] : memref<4x8x8xf32, #tpu.memory_space<vmem>>, vector<1x8x8xf32>
        %65 = vector.shape_cast %64 : vector<1x8x8xf32> to vector<8x8xf32>
        %66 = vector.shape_cast %62 : vector<8x8xf32> to vector<1x8x8xf32>
        tpu.vector_store %arg11[%63, %c0_27, %c0_28], %66 {strides = array<i32>} : memref<4x8x8xf32, #tpu.memory_space<vmem>>, vector<1x8x8xf32>,
        %67 = arith.index_cast %arg12 : i32 to index
        %c0_29 = arith.constant 0 : index
        %c0_30 = arith.constant 0 : index
        %68 = vector.load %arg9[%67, %c0_29, %c0_30] : memref<4x8x1xf32, #tpu.memory_space<vmem>>, vector<1x8x1xf32>
        %69 = vector.shape_cast %68 : vector<1x8x1xf32> to vector<8x1xf32>
        %70 = vector.shape_cast %38 : vector<8x1xf32> to vector<1x8x1xf32>
        tpu.vector_store %arg9[%67, %c0_29, %c0_30], %70 {strides = array<i32>} : memref<4x8x1xf32, #tpu.memory_space<vmem>>, vector<1x8x1xf32>,
      }
      %c4_i32_6 = arith.constant 4 : i32
    } else {
    }
    %6 = arith.cmpi eq, %arg2, %arg1 : i32
    %7 = arith.extui %6 : i1 to i32
    %c0_i32_2 = arith.constant 0 : i32
    %8 = arith.cmpi ne, %7, %c0_i32_2 : i32
    scf.if %8 {
      %c0 = arith.constant 0 : index
      %c0_3 = arith.constant 0 : index
      %c0_4 = arith.constant 0 : index
      %9 = vector.load %arg10[%c0, %c0_3, %c0_4] : memref<4x8x1xf32, #tpu.memory_space<vmem>>, vector<1x8x1xf32>
      %10 = vector.shape_cast %9 : vector<1x8x1xf32> to vector<8x1xf32>
      %11 = tpu.reciprocal %10 {approx = true} : vector<8x1xf32> -> vector<8x1xf32>
      %c0_5 = arith.constant 0 : index
      %c0_6 = arith.constant 0 : index
      %c0_7 = arith.constant 0 : index
      %12 = vector.load %arg11[%c0_5, %c0_6, %c0_7] : memref<4x8x8xf32, #tpu.memory_space<vmem>>, vector<1x8x8xf32>
      %13 = vector.shape_cast %12 : vector<1x8x8xf32> to vector<8x8xf32>
      %14 = vector.broadcast %11 : vector<8x1xf32> to vector<8x8xf32>
      %15 = arith.mulf %13, %14 : vector<8x8xf32>
      %16 = arith.truncf %15 : vector<8x8xf32> to vector<8x8xbf16>
      %c1 = arith.constant 1 : index
      %c0_8 = arith.constant 0 : index
      %c0_9 = arith.constant 0 : index
      %17 = vector.load %arg10[%c1, %c0_8, %c0_9] : memref<4x8x1xf32, #tpu.memory_space<vmem>>, vector<1x8x1xf32>
      %18 = vector.shape_cast %17 : vector<1x8x1xf32> to vector<8x1xf32>
      %19 = tpu.reciprocal %18 {approx = true} : vector<8x1xf32> -> vector<8x1xf32>
      %c1_10 = arith.constant 1 : index
      %c0_11 = arith.constant 0 : index
      %c0_12 = arith.constant 0 : index
      %20 = vector.load %arg11[%c1_10, %c0_11, %c0_12] : memref<4x8x8xf32, #tpu.memory_space<vmem>>, vector<1x8x8xf32>
      %21 = vector.shape_cast %20 : vector<1x8x8xf32> to vector<8x8xf32>
      %22 = vector.broadcast %19 : vector<8x1xf32> to vector<8x8xf32>
      %23 = arith.mulf %21, %22 : vector<8x8xf32>
      %24 = arith.truncf %23 : vector<8x8xf32> to vector<8x8xbf16>
      %c2 = arith.constant 2 : index
      %c0_13 = arith.constant 0 : index
      %c0_14 = arith.constant 0 : index
      %25 = vector.load %arg10[%c2, %c0_13, %c0_14] : memref<4x8x1xf32, #tpu.memory_space<vmem>>, vector<1x8x1xf32>
      %26 = vector.shape_cast %25 : vector<1x8x1xf32> to vector<8x1xf32>
      %27 = tpu.reciprocal %26 {approx = true} : vector<8x1xf32> -> vector<8x1xf32>
      %c2_15 = arith.constant 2 : index
      %c0_16 = arith.constant 0 : index
      %c0_17 = arith.constant 0 : index
      %28 = vector.load %arg11[%c2_15, %c0_16, %c0_17] : memref<4x8x8xf32, #tpu.memory_space<vmem>>, vector<1x8x8xf32>
      %29 = vector.shape_cast %28 : vector<1x8x8xf32> to vector<8x8xf32>
      %30 = vector.broadcast %27 : vector<8x1xf32> to vector<8x8xf32>
      %31 = arith.mulf %29, %30 : vector<8x8xf32>
      %32 = arith.truncf %31 : vector<8x8xf32> to vector<8x8xbf16>
      %c3 = arith.constant 3 : index
      %c0_18 = arith.constant 0 : index
      %c0_19 = arith.constant 0 : index
      %33 = vector.load %arg10[%c3, %c0_18, %c0_19] : memref<4x8x1xf32, #tpu.memory_space<vmem>>, vector<1x8x1xf32>
      %34 = vector.shape_cast %33 : vector<1x8x1xf32> to vector<8x1xf32>
      %35 = tpu.reciprocal %34 {approx = true} : vector<8x1xf32> -> vector<8x1xf32>
      %c3_20 = arith.constant 3 : index
      %c0_21 = arith.constant 0 : index
      %c0_22 = arith.constant 0 : index
      %36 = vector.load %arg11[%c3_20, %c0_21, %c0_22] : memref<4x8x8xf32, #tpu.memory_space<vmem>>, vector<1x8x8xf32>
      %37 = vector.shape_cast %36 : vector<1x8x8xf32> to vector<8x8xf32>
      %38 = vector.broadcast %35 : vector<8x1xf32> to vector<8x8xf32>
      %39 = arith.mulf %37, %38 : vector<8x8xf32>
      %40 = arith.truncf %39 : vector<8x8xf32> to vector<8x8xbf16>
      %41 = tpu.concatenate %16, %24, %32, %40 in 1 : vector<8x8xbf16>, vector<8x8xbf16>, vector<8x8xbf16>, vector<8x8xbf16> -> vector<8x32xbf16>
      %c0_23 = arith.constant 0 : index
      %c0_24 = arith.constant 0 : index
      %42 = vector.load %arg6[%c0_23, %c0_24] : memref<32x32xbf16, #tpu.memory_space<vmem>>, vector<32x32xbf16>
      %cst = arith.constant dense<0.000000e+00> : vector<8x32xf32>
      %43 = tpu.matmul %41, %42, %cst {dimension_numbers = #tpu.dot_dimension_numbers<[1], [0], [0], [1], [0, 0, 1, 1], [], []>} : vector<8x32xbf16>, vector<32x32xbf16>, vector<8x32xf32> -> vector<8x32xf32>
      %c0_25 = arith.constant 0 : index
      %c0_26 = arith.constant 0 : index
      %44 = vector.load %arg7[%c0_25, %c0_26] : memref<1x32xf32, #tpu.memory_space<vmem>>, vector<1x32xf32>
      %45 = vector.broadcast %44 : vector<1x32xf32> to vector<8x32xf32>
      %46 = arith.addf %43, %45 : vector<8x32xf32>
      %c0_27 = arith.constant 0 : index
      %c0_28 = arith.constant 0 : index
      %c0_29 = arith.constant 0 : index
      %47 = vector.load %arg8[%c0_27, %c0_28, %c0_29] : memref<1x8x32xf32, #tpu.memory_space<vmem>>, vector<1x8x32xf32>
      %48 = vector.shape_cast %47 : vector<1x8x32xf32> to vector<8x32xf32>
      %49 = vector.shape_cast %46 : vector<8x32xf32> to vector<1x8x32xf32>
      tpu.vector_store %arg8[%c0_27, %c0_28, %c0_29], %49 {strides = array<i32>} : memref<1x8x32xf32, #tpu.memory_space<vmem>>, vector<1x8x32xf32>,
    } else {
    }
    return
  }
  func.func @transform_0(%arg0: i32, %arg1: i32, %arg2: i32) -> (i32, i32, i32, i32) {
    %c0_i32 = arith.constant 0 : i32
    %c0_i32_0 = arith.constant 0 : i32
    %c0_i32_1 = arith.constant 0 : i32
    return %arg0, %c0_i32, %arg1, %c0_i32_0 : i32, i32, i32, i32
  }
  func.func @transform_1(%arg0: i32, %arg1: i32, %arg2: i32) -> (i32, i32, i32, i32) {
    %0 = arith.minsi %arg2, %arg1 : i32
    %c0_i32 = arith.constant 0 : i32
    %c0_i32_0 = arith.constant 0 : i32
    %c0_i32_1 = arith.constant 0 : i32
    return %arg0, %c0_i32, %0, %c0_i32_0 : i32, i32, i32, i32
  }
  func.func @transform_2(%arg0: i32, %arg1: i32, %arg2: i32) -> (i32, i32, i32, i32) {
    %0 = arith.minsi %arg2, %arg1 : i32
    %c0_i32 = arith.constant 0 : i32
    %c0_i32_0 = arith.constant 0 : i32
    %c0_i32_1 = arith.constant 0 : i32
    return %arg0, %c0_i32, %0, %c0_i32_0 : i32, i32, i32, i32
  }
  func.func @transform_3(%arg0: i32, %arg1: i32, %arg2: i32) -> (i32, i32) {
    %c0_i32 = arith.constant 0 : i32
    %c0_i32_0 = arith.constant 0 : i32
    %c0_i32_1 = arith.constant 0 : i32
    return %c0_i32, %c0_i32_0 : i32, i32
  }
  func.func @transform_4(%arg0: i32, %arg1: i32, %arg2: i32) -> (i32, i32) {
    %c0_i32 = arith.constant 0 : i32
    %c0_i32_0 = arith.constant 0 : i32
    %c0_i32_1 = arith.constant 0 : i32
    return %c0_i32, %c0_i32_0 : i32, i32
  }
  func.func @transform_5(%arg0: i32, %arg1: i32, %arg2: i32) -> (i32, i32, i32) {
    %c0_i32 = arith.constant 0 : i32
    %c0_i32_0 = arith.constant 0 : i32
    return %arg0, %arg1, %c0_i32 : i32, i32, i32
  }
}

</mosaic_0001>

<bundles_post_ra>
// kernel: attention_forward.2
= control target key start
LH: loop header
LB: loop body
LE: loop exit
PB: predicated region body
PF: predicated region fallthrough
CT: control target
= control target key end

     0   :  { %s899_s18 = smov 0   ;;  %s901_s19 = smov 0   ;;  %s984_s0 = inlined_call_operand.vmem [shape: f32[2,16,32], index: 0, kind: input, shape index: {}]   ;;  %s985_s1 = inlined_call_operand.vmem [shape: bf16[4,32,24], index: 1, kind: input, shape index: {}]   ;;  %s986_s2 = inlined_call_operand.vmem [shape: f32[4,1,24], index: 2, kind: input, shape index: {}]   ;;  %s987_s3 = inlined_call_operand.vmem [shape: bf16[2,4,16,8], index: 3, kind: output, shape index: {0}]   ;;  %s988_s4 = inlined_call_operand.vmem [shape: bf16[2,4,16,8], index: 4, kind: output, shape index: {1}]   ;;  %s989_s5 = inlined_call_operand.vmem [shape: bf16[2,4,16,8], index: 5, kind: output, shape index: {2}]  }
   0x1   :  { %s903_s20 = smov 0   ;;  %s905_s21 = smov 0  }
   0x2   :  { %s907_s22 = smov 0   ;;  %s909_s23 = smov 0  }
   0x3   :  { %s911_s24 = smov 0  }
   0x4 LB: > { %s28_s25 = sadd.s32 1, %s851_s21  ;;  %s31_s26 = sadd.s32 1, %s855_s22  ;;  %s863_s24 = sphi %s911_s24, %s16_s24   ;;  %s859_s23 = sphi %s909_s23, %s995_s23   ;;  %s855_s22 = sphi %s907_s22, %s994_s22   ;;  %s851_s21 = sphi %s905_s21, %s993_s21   ;;  %s847_s20 = sphi %s903_s20, %s992_s20   ;;  %s843_s19 = sphi %s901_s19, %s991_s19   ;;  %s839_s18 = sphi %s899_s18, %s990_s18  }
   0x5   : > { %p29_p0 = scmp.ge.s32.totalorder %s28_s25, 4  ;;  %p713_p1 = scmp.ge.s32.totalorder %s863_s24, 1 }
   0x6   : > { %p246_p2 = scmp.lt.s32.totalorder %s863_s24, 17  ;;  %s35_s27 = sadd.s32 1, %s859_s23 }
   0x7   : > { %s997_s25 = smov (%p29_p0, %s28_s25), 0  ;;  %s999_s26 = smov (!%p29_p0, %s31_s26), %s855_s22 }
   0x8   : > { %p247_p3 = pnand %p713_p1, %p246_p2  ;;  %p33_p4 = scmp.ge.s32.totalorder %s999_s26, 2 }
   0x9   : > { %p324_p6 = scmp.lt.s32.totalorder (!%p247_p3), %s839_s18, 3  ;;  %p316_p7 = scmp.lt.s32.totalorder (!%p247_p3), %s847_s20, 1  ;;  %v865_v0 = vmov (!%p247_p3), 0.0   ;;  %vm866_vm0 = vmmov (!%p247_p3), 0   ;;  %vm394_vm1 = vcmask (!%p247_p3), 261120   ;;  %vm440_vm2 = vcmask (!%p247_p3), 60416  }
   0xa   : > { %s1001_s26 = smov (%p33_p4, %s999_s26), 0  ;;  %s1003_s27 = smov (!%p33_p4, %s35_s27), %s859_s23 }
   0xb   : > { %p37_p5 = scmp.ge.s32.totalorder %s1003_s27, 2  ;;  %250 = sbr.rel (%p247_p3) target bundleno = 365 (0x16d), region = 32  ;;  %739 = vmatprep.subr.bf16.mxu0 (!%p247_p3), %v865_v0  ;;  %743 = vmatprep.mubr.msk.bf16.mxu0 (!%p247_p3), %vm866_vm0, %v865_v0 }
   0xc   : > { %p318_p8 = scmp.lt.s32.totalorder (!%p247_p3), %s843_s19, 1 }
   0xd   : > { %s1005_s27 = smov (%p37_p5, %s1003_s27), 0 }
  0x12   : > { %s1007_s18 = smov (!%p324_p6, %s839_s18), 3  ;;  %s1009_s20 = smov (!%p316_p7, %s847_s20), 1 }
  0x13   : > { %s734_s28 = sshll.u32 %s1007_s18, 4  ;;  %s714_s7 = sshll.u32 %s1009_s20, 1 }
  0x14   : > { %s328_s6 = scalar_lea.vmem %s985_s1, %s734_s28  ;;  %s1011_s19 = smov (!%p318_p8, %s843_s19), 1 }
  0x15   : > { %v807_v1 = vld [vmem:[%s328_s6] sm:$0xff]   ;;  %v808_v2 = vld [vmem:[%s328_s6 + $0x8] sm:$0xff]   ;;  %s321_s8 = sadd.s32 %s714_s7, %s1011_s19  ;;  %s718_s13 = sshll.u32 %s1007_s18, 1 }
  0x16   : > { %740 = vmatpush3.bf16.msra.mxu0 %v807_v1  ;;  %s715_s9 = sshll.u32 %s321_s8, 3  ;;  %s331_s16 = scalar_lea.vmem %s986_s2, %s1007_s18 }
  0x17   : > { %741 = vmatprep.subr.bf16.mxu0 %v865_v0  ;;  %s323_s12 = scalar_lea.vmem %s984_s0, %s715_s9  ;;  %s339_s17 = sadd.s32 %s718_s13, %s1011_s19  ;;  %v727_v5 = vld [vmem:[%s331_s16] ss:$0 sm:$0xff] }
  0x18   : > { %v369_v3 = vld [vmem:[%s323_s12] sm:$0xff]  ;;  %s719_s28 = sshll.u32 %s1009_s20, 3  ;;  %s867_s9 = smov 120  }
  0x19   : > { %v370_v4 = vpack.c.bf16 %v369_v3, %v369_v3  ;;  %s341_s29 = sadd.s32 %s719_s28, %s339_s17  ;;  %s868_s18 = smov 112  }
  0x1a   : > { %742 = vmatpush3.bf16.msra.mxu0 %v808_v2  ;;  %s720_s30 = sshll.u32 %s341_s29, 2 }
  0x1b   : > { %s343_s8 = scalar_lea.vmem %s987_s3, %s720_s30  ;;  %s355_s10 = scalar_lea.vmem %s988_s4, %s720_s30 }
  0x1c   : > { %s367_s13 = scalar_lea.vmem %s989_s5, %s720_s30 }
  0x1d   : > { %744 = vmatmul.mubr.msk.bf16.vlgmr.msra.gmra.mrb[0].mxu0 %vm394_vm1, %v370_v4 }
  0xf0   : > { %v432_v6 = vpop.f32.mrb[0].mxu0 }
  0xf1   : > { %v433_v7 = vadd.f32 %v727_v5, %v432_v6  ;;  %v745_v8 = vpop.f32.mrb[1].mxu0 }
  0xf2   : > { %v435_v9 = vpop.f32.mrb[2].mxu0 }
  0xf3   : > { %v438_v10 = vmul.f32 0.35355338, %v433_v7  ;;  %v746_v11 = vpop.f32.mrb[3].mxu0  ;;  %v735_v12 = vpack.c.bf16 %v433_v7, %v433_v7 }
  0xf5   : > { %v439_v13 = vpack.c.bf16 %v438_v10, %v438_v10  ;;  %446 = vrot.lane.b32.xlu0 %v735_v12, %s867_s9 }
  0xf7   : > { %441 = vst.msk [vmem:[%s343_s8] sm:$0xf] %vm440_vm2, %v439_v13 }
  0xf9   : > { %450 = vrot.lane.b32.xlu0 %v735_v12, %s868_s18 }
 0x167   : > { %v447_v14 = vpop.permute.xlu0 %446 }
 0x168   : > { %449 = vst.msk [vmem:[%s355_s10] sm:$0xf] %vm440_vm2, %v447_v14 }
 0x16b   : > { %v451_v15 = vpop.permute.xlu0 %450 }
 0x16c   : > { %453 = vst.msk [vmem:[%s367_s13] sm:$0xf] %vm440_vm2, %v451_v15 }
 0x16d PF: > { %s16_s24 = sadd.s32 1, %s863_s24   ;;  %s990_s18 = smov %s851_s21 }
 0x16e   : > { %p13_p9 = scmp.ge.s32.totalorder %s16_s24, 18   ;;  %s991_s19 = smov %s855_s22 }
 0x16f   : > { %s992_s20 = smov %s859_s23  ;;  %s993_s21 = smov %s997_s25 }
 0x170   : > { %s994_s22 = smov %s1001_s26  ;;  %s995_s23 = smov %s1005_s27 }
 0x171   :  { %15 = sbr.rel (!%p13_p9) target bundleno = 4 (0x4), region = 92 }

// kernel: attention_forward.3
= control target key start
LH: loop header
LB: loop body
LE: loop exit
PB: predicated region body
PF: predicated region fallthrough
CT: control target
= control target key end

     0   :  { %s1620_s0 = inlined_call_operand.vmem [shape: bf16[2,4,16,8], index: 0, kind: input, shape index: {}]   ;;  %s1621_s1 = inlined_call_operand.vmem [shape: bf16[2,4,16,8], index: 1, kind: input, shape index: {}]   ;;  %s1622_s2 = inlined_call_operand.vmem [shape: bf16[2,4,16,8], index: 2, kind: input, shape index: {}]   ;;  %s1623_s3 = inlined_call_operand.vmem [shape: bf16[32,32], index: 3, kind: input, shape index: {}]   ;;  %s1624_s4 = inlined_call_operand.vmem [shape: f32[1,32], index: 4, kind: input, shape index: {}]   ;;  %s1625_s5 = inlined_call_operand.hbm [shape: f32[2,16,32], index: 5, kind: output, shape index: {}]  }
   0x1   :  { %1630 = sst [smem:[#allocation15_spill]] %s1620_s0 }
   0x2   :  { %1631 = sst [smem:[#allocation16_spill]] %s1621_s1 }
   0x3   :  { %1632 = sst [smem:[#allocation17_spill]] %s1623_s3 }
   0x4   :  { %1633 = sst [smem:[#allocation18_spill]] %s1624_s4 }
   0x5   :  { %1634 = sst [smem:[#allocation19_spill]] %s1625_s5 }
   0x6   :  { %10 = vsyncpa [#allocation9], 0 }
   0x7   :  { %12 = vsyncpa [#allocation9 + $0x1], 0  ;;  %s1334_s18 = smov 0   ;;  %s1336_s19 = smov 0  }
   0x8   :  { %s1338_s20 = smov 0   ;;  %s1340_s21 = smov 0  }
   0x9   :  { %s1342_s22 = smov 0   ;;  %s1344_s23 = smov 0  }
   0xa   :  { %s1346_s24 = smov 0   ;;  %s1348_s25 = smov 0  }
   0xb   :  { %s1350_s26 = smov 0   ;;  %s1352_s27 = smov 0  }
   0xc   :  { %s1354_s28 = smov 0   ;;  %s1356_s29 = smov 0  }
   0xd LB: > { %1635 = sst [smem:[#allocation11_spill]] %s1265_s24  ;;  %s949_s30 = sadd.s32 4294967295, %s1285_s29   ;;  %s1285_s29 = sphi %s1356_s29, %s18_s29   ;;  %s1281_s28 = sphi %s1354_s28, %s1666_s28   ;;  %s1277_s27 = sphi %s1352_s27, %s1665_s27   ;;  %s1273_s26 = sphi %s1350_s26, %s1664_s26   ;;  %s1269_s25 = sphi %s1348_s25, %s1663_s25   ;;  %s1265_s24 = sphi %s1346_s24, %s1662_s24   ;;  %s1261_s23 = sphi %s1344_s23, %s1655_s23   ;;  %s1257_s22 = sphi %s1342_s22, %s1661_s22   ;;  %s1253_s21 = sphi %s1340_s21, %s1660_s21   ;;  %s1249_s20 = sphi %s1338_s20, %s1659_s20   ;;  %s1245_s19 = sphi %s1336_s19, %s1658_s19   ;;  %s1241_s18 = sphi %s1334_s18, %s1657_s18  }
   0xe   : > { %1636 = sst [smem:[#allocation12_spill]] %s1269_s25  ;;  %s30_s7 = sadd.s32 1, %s1273_s26 }
   0xf   : > { %1637 = sst [smem:[#allocation13_spill]] %s1273_s26  ;;  %s33_s8 = sadd.s32 1, %s1277_s27 }
  0x10   : > { %p31_p0 = scmp.ge.s32.totalorder %s30_s7, 2  ;;  %s37_s9 = sadd.s32 1, %s1281_s28 }
  0x11   : > { %s46_s10 = sadd.s32 1, %s1257_s22  ;;  %p53_p1 = scmp.ne.s32.totalorder %s1257_s22, %s1253_s21 }
  0x12   : > { %s1668_s7 = smov (%p31_p0, %s30_s7), 0  ;;  %s1670_s8 = smov (!%p31_p0, %s33_s8), %s1277_s27 }
  0x13   : > { %p54_p2 = scmp.eq.s32.totalorder %s1285_s29, 0  ;;  %p69_p3 = scmp.lt.s32.totalorder %s1273_s26, %s1277_s27 }
  0x14   : > { %p35_p4 = scmp.ge.s32.totalorder %s1670_s8, 2  ;;  %s78_s11 = sadd.s32 1, %s1249_s20 }
  0x15   : > { %p1412_p5 = por %p54_p2, %p53_p1  ;;  %p85_p6 = scmp.ne.s32.totalorder %s1249_s20, %s1245_s19 }
  0x16   : > { %s1672_s8 = smov (%p35_p4, %s1670_s8), 0  ;;  %s1674_s9 = smov (!%p35_p4, %s37_s9), %s1281_s28 }
  0x17   : > { %s42_s13 = ssub.s32 %s1277_s27, %s1672_s8  ;;  %p71_p7 = scmp.lt.s32.totalorder %s1668_s7, %s1672_s8 }
  0x18   : > { %p39_p8 = scmp.ge.s32.totalorder %s1674_s9, 2  ;;  %p1425_p9 = por %p85_p6, %p54_p2 }
  0x19   : > { %s1431_s15 = scalar_select %p69_p3, %s1273_s26, %s1277_s27 }
  0x1a   : > { %s1676_s9 = smov (%p39_p8, %s1674_s9), 0  ;;  %p191_p10 = scmp.eq.s32.totalorder %s949_s30, 7 }
  0x1b   : > { %1640 = sst [smem:[#allocation14_spill]] %s1676_s9  ;;  %s41_s17 = ssub.s32 %s1281_s28, %s1676_s9 }
  0x1c   : > { %s72_s16 = scalar_select %p71_p7, %s1668_s7, %s1672_s8 }
  0x1d   : > { %s43_s6 = sor.u32 %s42_s13, %s41_s17  ;;  %p1443_p13 = por %p191_p10, %p53_p1 }
  0x1e   : > { %s74_s5 = ssub.s32 %s1431_s15, %s72_s16  ;;  %p44_p11 = scmp.eq.s32.totalorder %s43_s6, 0 }
  0x1f   : > { %s75_s25 = sor.u32 %s74_s5, %s41_s17  ;;  %p196_p0 = scmp.ne.s32.totalorder %s1253_s21, %s1241_s18 }
  0x20   : > { %p76_p12 = scmp.eq.s32.totalorder %s75_s25, 0  ;;  %s1642_s24 = sadd.s32 4294967294, %s1285_s29  }
  0x21   : > { %s1448_s3 = scalar_select %p44_p11, %s1257_s22, %s46_s10  }
  0x22   : > { %s1451_s26 = scalar_select %p76_p12, %s1249_s20, %s78_s11  }
  0x23   : > { %p197_p2 = scmp.eq.s32.totalorder %s1642_s24, 7  ;;  %p952_p4 = scmp.ge.s32.totalorder %s1285_s29, 8 }
  0x25   : > { %p1457_p3 = por %p197_p2, %p196_p0  ;;  %219 = sbr.rel (%p952_p4) target bundleno = 76 (0x4c), region = 24 }
  0x2c   : > { %222 = sbr.rel (!%p1412_p5) target bundleno = 56 (0x38), region = 28  ;;  %s224_s5 = sand.u32 (%p1412_p5), 1, %s1257_s22  }
  0x2d   : > { %s954_s25 = sshll.u32 (%p1412_p5), %s1281_s28, 3  ;;  %s953_s30 = sshll.u32 (%p1412_p5), %s224_s5, 4 }
  0x2e   : > { %s228_s6 = sadd.s32 (%p1412_p5), %s1277_s27, %s954_s25  ;;  %s1644_s0 = sld [smem:[#allocation15_spill]] (%p1412_p5) }
  0x2f   : > { %s955_s10 = sshll.u32 (%p1412_p5), %s228_s6, 2  ;;  %s226_s16 = scalar_lea.vmem (%p1412_p5), [#allocation5], %s953_s30 }
  0x34   : > { %s230_s13 = scalar_lea.vmem %s1644_s0, %s955_s10 }
  0x35   : > { %v246_v0 = vld [vmem:[%s230_s13] sm:$0xf]  ;;  %v248_v1 = vld [vmem:[%s230_s13 + $0x8] sm:$0xf]  ;;  %v250_v2 = vld [vmem:[%s230_s13 + $0x10] sm:$0xf] }
  0x36   : > { %247 = vst [vmem:[%s226_s16] sm:$0xf] %v246_v0  ;;  %249 = vst [vmem:[%s226_s16 + $0x4] sm:$0xf] %v248_v1  ;;  %v252_v3 = vld [vmem:[%s230_s13 + $0x18] sm:$0xf] }
  0x37   : > { %251 = vst [vmem:[%s226_s16 + $0x8] sm:$0xf] %v250_v2  ;;  %253 = vst [vmem:[%s226_s16 + $0xc] sm:$0xf] %v252_v3 }
  0x38 PF: > { %284 = sbr.rel (!%p1425_p9) target bundleno = 68 (0x44), region = 69  ;;  %s286_s12 = sand.u32 (%p1425_p9), 1, %s1249_s20  }
  0x39   : > { %s957_s17 = sshll.u32 (%p1425_p9), %s1281_s28, 3  ;;  %s956_s5 = sshll.u32 (%p1425_p9), %s286_s12, 4 }
  0x3a   : > { %s292_s25 = sadd.s32 (%p1425_p9), %s957_s17, %s1431_s15  ;;  %s1645_s1 = sld [smem:[#allocation16_spill]] (%p1425_p9) }
  0x3b   : > { %s958_s6 = sshll.u32 (%p1425_p9), %s292_s25, 2  ;;  %s288_s24 = scalar_lea.vmem (%p1425_p9), [#allocation6], %s956_s5 }
  0x40   : > { %s294_s30 = scalar_lea.vmem %s1645_s1, %s958_s6 }
  0x41   : > { %v310_v4 = vld [vmem:[%s294_s30] sm:$0xf]  ;;  %v312_v5 = vld [vmem:[%s294_s30 + $0x8] sm:$0xf]  ;;  %v314_v6 = vld [vmem:[%s294_s30 + $0x10] sm:$0xf] }
  0x42   : > { %311 = vst [vmem:[%s288_s24] sm:$0xf] %v310_v4  ;;  %313 = vst [vmem:[%s288_s24 + $0x4] sm:$0xf] %v312_v5  ;;  %v316_v7 = vld [vmem:[%s294_s30 + $0x18] sm:$0xf] }
  0x43   : > { %315 = vst [vmem:[%s288_s24 + $0x8] sm:$0xf] %v314_v6  ;;  %317 = vst [vmem:[%s288_s24 + $0xc] sm:$0xf] %v316_v7 }
  0x44 PF: > { %348 = sbr.rel (!%p1425_p9) target bundleno = 76 (0x4c), region = 110  ;;  %s350_s13 = sand.u32 (%p1425_p9), 1, %s1249_s20  }
  0x45   : > { %s960_s16 = sshll.u32 (%p1425_p9), %s1281_s28, 3  ;;  %s959_s12 = sshll.u32 (%p1425_p9), %s350_s13, 4 }
  0x46   : > { %s356_s17 = sadd.s32 (%p1425_p9), %s960_s16, %s1431_s15  ;;  %s352_s11 = scalar_lea.vmem (%p1425_p9), [#allocation7], %s959_s12 }
  0x47   : > { %s961_s25 = sshll.u32 (%p1425_p9), %s356_s17, 2 }
  0x48   : > { %s358_s5 = scalar_lea.vmem (%p1425_p9), %s1622_s2, %s961_s25 }
  0x49   : > { %v374_v8 = vld [vmem:[%s358_s5] sm:$0xf] (%p1425_p9)  ;;  %v376_v9 = vld [vmem:[%s358_s5 + $0x8] sm:$0xf] (%p1425_p9)  ;;  %v378_v10 = vld [vmem:[%s358_s5 + $0x10] sm:$0xf] (%p1425_p9) }
  0x4a   : > { %375 = vst [vmem:[%s352_s11] sm:$0xf] (%p1425_p9), %v374_v8  ;;  %377 = vst [vmem:[%s352_s11 + $0x4] sm:$0xf] (%p1425_p9), %v376_v9  ;;  %v380_v11 = vld [vmem:[%s358_s5 + $0x18] sm:$0xf] (%p1425_p9) }
  0x4b   : > { %379 = vst [vmem:[%s352_s11 + $0x8] sm:$0xf] %v378_v10  ;;  %381 = vst [vmem:[%s352_s11 + $0xc] sm:$0xf] %v380_v11 }
  0x4c PF: > { %p962_p1 = scmp.ge.s32.totalorder %s1285_s29, 1  ;;  %p411_p5 = scmp.lt.s32.totalorder %s1285_s29, 9 }
  0x4e   : > { %p412_p6 = pnand %p962_p1, %p411_p5 }
  0x4f   : > { %s1489_s14 = sand.u32 (!%p412_p6), 1, %s1253_s21   ;;  %s425_s15 = sand.u32 (!%p412_p6), 1, %s1245_s19  }
  0x50   : > { %415 = sbr.rel (%p412_p6) target bundleno = 1359 (0x54f), region = 151  ;;  %s963_s30 = sshll.u32 (!%p412_p6), %s1489_s14, 4 }
  0x51   : > { %s1493_s24 = sshll.u32 (!%p412_p6), %s425_s15, 4  ;;  %s966_s13 = sshll.u32 (!%p412_p6), %s1489_s14, 3 }
  0x52   : > { %s1496_s16 = scalar_lea.vmem (!%p412_p6), [#allocation5], %s963_s30  ;;  %s427_s12 = scalar_lea.vmem (!%p412_p6), [#allocation6], %s1493_s24 }
  0x53   : > { %s434_s17 = scalar_lea.vmem (!%p412_p6), [#allocation7], %s1493_s24  ;;  %s1500_s25 = scalar_lea.vmem (!%p412_p6), [#allocation8], %s966_s13 }
  0x54   : > { %p967_p7 = scmp.ne.s32.totalorder (!%p412_p6), %s1261_s23, 0 }
  0x57   : > { %475 = sbr.rel (%p967_p7) target bundleno = 94 (0x5e), region = 167  ;;  %vm476_vm0 = vcmask (!%p967_p7), 7168   ;;  %vm485_vm1 = vcmask (!%p967_p7), 64512   ;;  %v1291_v12 = vmov (!%p967_p7), -inf   ;;  %v1292_v13 = vmov (!%p967_p7), 0.0  }
  0x58   : > { %477 = vst.msk [vmem:[#allocation2] sm:$0xff] (!%p967_p7), %vm476_vm0, %v1291_v12  ;;  %478 = vst.msk [vmem:[#allocation2 + $0x8] sm:$0xff] (!%p967_p7), %vm476_vm0, %v1291_v12 }
  0x59   : > { %479 = vst.msk [vmem:[#allocation2 + $0x10] sm:$0xff] (!%p967_p7), %vm476_vm0, %v1291_v12  ;;  %480 = vst.msk [vmem:[#allocation2 + $0x18] sm:$0xff] (!%p967_p7), %vm476_vm0, %v1291_v12 }
  0x5a   : > { %481 = vst.msk [vmem:[#allocation3] sm:$0xff] (!%p967_p7), %vm476_vm0, %v1292_v13  ;;  %482 = vst.msk [vmem:[#allocation3 + $0x8] sm:$0xff] (!%p967_p7), %vm476_vm0, %v1292_v13 }
  0x5b   : > { %483 = vst.msk [vmem:[#allocation3 + $0x10] sm:$0xff] (!%p967_p7), %vm476_vm0, %v1292_v13  ;;  %484 = vst.msk [vmem:[#allocation3 + $0x18] sm:$0xff] (!%p967_p7), %vm476_vm0, %v1292_v13 }
  0x5c   : > { %486 = vst.msk [vmem:[#allocation4] sm:$0xff] (!%p967_p7), %vm485_vm1, %v1292_v13  ;;  %487 = vst.msk [vmem:[#allocation4 + $0x8] sm:$0xff] (!%p967_p7), %vm485_vm1, %v1292_v13 }
  0x5d   : > { %488 = vst.msk [vmem:[#allocation4 + $0x10] sm:$0xff] (!%p967_p7), %vm485_vm1, %v1292_v13  ;;  %489 = vst.msk [vmem:[#allocation4 + $0x18] sm:$0xff] (!%p967_p7), %vm485_vm1, %v1292_v13 }
  0x5e PF: > { %s1646_s19 = sld [smem:[#allocation11_spill]] }
  0x64   : > { %p968_p8 = scmp.gt.s32.totalorder %s1261_s23, %s1646_s19 }
  0x65   : > { %s1647_s6 = sld [smem:[#allocation11_spill]] (!%p968_p8)  ;;  %v495_v14 = vlaneseq (!%p968_p8)  ;;  %s970_s5 = sshll.u32 (!%p968_p8), %s1261_s23, 3  ;;  %v1293_v21 = vmov (!%p968_p8), -1e+09  }
  0x66   : > { %493 = sbr.rel (%p968_p8) target bundleno = 843 (0x34b), region = 171  ;;  %v502_v16 = vstv (!%p968_p8), %s970_s5  ;;  %s1509_s11 = smov (!%p968_p8), 0  }
  0x67   : > { %v496_v17 = vshrl.u32 (!%p968_p8), %v495_v14, 7  ;;  %v501_v18 = vand.u32 (!%p968_p8), 127, %v495_v14 }
  0x69   : > { %v503_v20 = vadd.s32 (!%p968_p8), %v502_v16, %v501_v18 }
  0x6b   : > { %s969_s10 = sshll.u32 (!%p968_p8), %s1647_s6, 3 }
  0x6c   : > { %v497_v15 = vstv (!%p968_p8), %s969_s10 }
  0x6d   : > { %v498_v19 = vadd.s32 %v497_v15, %v496_v17 }
  0x6f   : > { %vm504_vm2 = vcmp.le.s32.totalorder %v503_v20, %v498_v19 }
  0x70   : > { %v1507_v22 = vsel %vm504_vm2, 0.0, %v1293_v21 }
  0x71 LB: >> { %v1294_v23 = vmov 0.0   ;;  %vm1295_vm3 = vmmov 0   ;;  %s1515_s15 = sshll.u32 %s1289_s11, 2  ;;  %vm521_vm4 = vcmask 64512   ;;  %v1296_v33 = vmov 0   ;;  %s1527_s19 = sshll.u32 %s1289_s11, 3  ;;  %s1289_s11 = sphi %s1509_s11, %s511_s11  }
  0x72   : >> { %994 = vmatprep.subr.bf16.mxu0 %v1294_v23  ;;  %996 = vmatprep.mubr.msk.bf16.mxu0 %vm1295_vm3, %v1294_v23  ;;  %s516_s30 = scalar_lea.vmem %s427_s12, %s1515_s15 [#allocation6]  ;;  %s513_s13 = scalar_lea.vmem %s1496_s16, %s1515_s15 [#allocation5]  ;;  %vm593_vm5 = vcmask 7168   ;;  %vm607_vm6 = vcmask 1043456  }
  0x73   : >> { %1000 = vmatprep.subr.bf16.mxu1 %v1294_v23  ;;  %1002 = vmatprep.mubr.msk.bf16.mxu1 %vm1295_vm3, %v1294_v23  ;;  %v517_v24 = vld [vmem:[%s516_s30] sm:$0xf]  ;;  %s569_s6 = scalar_lea.vmem [#allocation2], %s1527_s19  ;;  %s519_s10 = scalar_lea.vmem %s434_s17, %s1515_s15 [#allocation7] }
  0x74   : >> { %v526_v25 = vsel %vm521_vm4, %v517_v24, 0  ;;  %v514_v26 = vld [vmem:[%s513_s13] sm:$0xf]  ;;  %1137 = vset.pattern.permute.xlu0 %v1296_v33  ;;  %1138 = vset.pattern.permute.xlu1 %v1296_v33  ;;  %s586_s5 = scalar_lea.vmem [#allocation3], %s1527_s19  ;;  %s595_s15 = scalar_lea.vmem [#allocation4], %s1527_s19 }
  0x75   : >> { %995 = vmatpush3.bf16.xpose.msra.mxu0 %v526_v25  ;;  %v570_v34 = vld [vmem:[%s569_s6] sm:$0xff]  ;;  %s511_s11 = sadd.s32 1, %s1289_s11  }
  0x76   : >> { %v520_v38 = vld [vmem:[%s519_s10] sm:$0xf]  ;;  %p508_p9 = scmp.ge.s32.totalorder %s511_s11, 4  }
  0x77   : >> { %v609_v39 = vsel %vm607_vm6, %v520_v38, 0  ;;  %v587_v48 = vld [vmem:[%s586_s5] sm:$0xff] }
  0x78   : >> { %1001 = vmatpush3.bf16.msra.mxu1 %v609_v39  ;;  %v596_v52 = vld [vmem:[%s595_s15] sm:$0xff] }
  0x7c   : >> { %997 = vmatmul.mubr.msk.bf16.vlgmr.msra.gmra.mrb[0].mxu0 %vm521_vm4, %v514_v26 }
 0x14f   : >> { %v562_v27 = vpop.f32.mrb[0].mxu0 }
 0x150   : >> { %v563_v28 = vadd.f32 %v562_v27, %v1507_v22  ;;  %v998_v29 = vpop.f32.mrb[1].mxu0 }
 0x151   : >> { %v565_v30 = vpop.f32.mrb[2].mxu0 }
 0x152   : >> { %v999_v31 = vpop.f32.mrb[3].mxu0  ;;  %v571_v32 = vsel %vm521_vm4, %v563_v28, -inf }
 0x153   : >> { %572 = vmax.xlane.f32.xlu0 %v571_v32 }
 0x1e0   : >> { %v573_v35 = vpop.xlane.xlu0 %572 }
 0x1e1   : >> { %v574_v36 = vmax.f32 %v570_v34, %v573_v35 }
 0x1e3   : >> { %v575_v37 = vsub.f32 %v570_v34, %v574_v36  ;;  %653 = vst.msk [vmem:[%s569_s6] sm:$0xff] %vm593_vm5, %v574_v36  ;;  %580 = vperm.xlu0 %1137, %v574_v36  }
 0x1e5   : >> { %v576_v46 = vmul.f32 1.442695, %v575_v37 }
 0x262   : >> { %v581_v40 = vpop.permute.xlu0 %580 }
 0x263   : >> { %v583_v41 = vsub.f32 %v563_v28, %v581_v40 }
 0x265   : >> { %v584_v42 = vmul.f32 1.442695, %v583_v41 }
 0x267   : >> { %1139 = vpow2.f32 %v584_v42 }
 0x268   : >> { %1141 = vpow2.f32 %v576_v46 }
 0x271   : >> { %v1140_v43 = vpop.eup %1139 }
 0x272   : >> { %v589_v44 = vsel %vm521_vm4, %v1140_v43, 0.0  ;;  %v603_v45 = vpack.c.bf16 %v1140_v43, %v1140_v43  ;;  %v1142_v47 = vpop.eup %1141 }
 0x273   : >> { %590 = vadd.xlane.f32.xlu1 %v589_v44  ;;  %v588_v49 = vmul.f32 %v1142_v47, %v587_v48 }
 0x274   : >> { %1003 = vmatmul.mubr.msk.bf16.vlgmr.msra.gmra.mrb[0].mxu1 %vm521_vm4, %v603_v45 }
 0x284   : >> { %599 = vperm.xlu1 %1138, %v1142_v47  }
 0x300   : >> { %v591_v50 = vpop.xlane.xlu1 %590 }
 0x301   : >> { %v592_v51 = vadd.f32 %v591_v50, %v588_v49 }
 0x303   : >> { %594 = vst.msk [vmem:[%s586_s5] sm:$0xff] %vm593_vm5, %v592_v51 }
 0x304   : >> { %v600_v53 = vpop.permute.xlu1 %599 }
 0x305   : >> { %v602_v54 = vmul.f32 %v600_v53, %v596_v52 }
 0x344   : > { %510 = sbr.rel (!%p508_p9) target bundleno = 113 (0x71), region = 250 }
 0x347   : >> { %v645_v55 = vpop.f32.mrb[0].mxu1 }
 0x348   : >> { %v651_v56 = vadd.f32 %v645_v55, %v602_v54  ;;  %v1004_v57 = vpop.f32.mrb[1].mxu1 }
 0x349   : >> { %v648_v58 = vpop.f32.mrb[2].mxu1 }
 0x34a   : >> { %652 = vst.msk [vmem:[%s595_s15] sm:$0xff] %vm521_vm4, %v651_v56  ;;  %v1005_v59 = vpop.f32.mrb[3].mxu1 }
 0x34b PF: > { %s1648_s30 = sld [smem:[#allocation11_spill]] }
 0x351   : > { %p977_p10 = scmp.ne.s32.totalorder %s1261_s23, %s1648_s30 }
 0x352   : > { %v669_v60 = vld [vmem:[#allocation3 + $0x8] sm:$0xff] (!%p977_p10)  ;;  %v693_v61 = vld [vmem:[#allocation3 + $0x18] sm:$0xff] (!%p977_p10)  ;;  %v681_v62 = vld [vmem:[#allocation3 + $0x10] sm:$0xff] (!%p977_p10)  ;;  %v1297_v63 = vmov (!%p977_p10), 0   ;;  %s1649_s16 = sld [smem:[#allocation17_spill]] (!%p977_p10)  ;;  %v1298_v6 = vmov (!%p977_p10), 0.0  }
 0x353   : > { %657 = sbr.rel (%p977_p10) target bundleno = 1330 (0x532), region = 182  ;;  %1143 = vset.pattern.permute.xlu0 (!%p977_p10), %v1297_v63  ;;  %1144 = vset.pattern.permute.xlu1 (!%p977_p10), %v1297_v63  ;;  %1147 = vrcp.f32 (!%p977_p10), %v669_v60  ;;  %v658_v0 = vld [vmem:[#allocation3] sm:$0xff] (!%p977_p10)  ;;  %vm1299_vm7 = vmmov (!%p977_p10), 0   ;;  %v672_v8 = vld [vmem:[#allocation4 + $0x8] sm:$0xff] (!%p977_p10)  ;;  %v696_v9 = vld [vmem:[#allocation4 + $0x18] sm:$0xff] (!%p977_p10)  ;;  %s1300_s11 = smov (!%p977_p10), 8  }
 0x354   : > { %1149 = vrcp.f32 (!%p977_p10), %v693_v61  ;;  %1006 = vmatprep.subr.bf16.mxu0 (!%p977_p10), %v1298_v6  ;;  %1010 = vmatprep.mubr.msk.bf16.mxu0 (!%p977_p10), %vm1299_vm7, %v1298_v6  ;;  %v684_v14 = vld [vmem:[#allocation4 + $0x10] sm:$0xff] (!%p977_p10)  ;;  %s1301_s13 = smov (!%p977_p10), 16   ;;  %s1302_s19 = smov (!%p977_p10), 24   ;;  %v660_v20 = vld [vmem:[#allocation4] sm:$0xff] (!%p977_p10)  ;;  %vm713_vm8 = vcmask (!%p977_p10), 64512   ;;  %vm717_vm9 = vcmask (!%p977_p10), 130048  }
 0x355   : > { %1151 = vrcp.f32 (!%p977_p10), %v681_v62  ;;  %vm720_vm10 = vcmask (!%p977_p10), 195584   ;;  %vm746_vm11 = vcmask (!%p977_p10), 261120   ;;  %s1650_s5 = sld [smem:[#allocation18_spill]] (!%p977_p10) }
 0x356   : > { %1153 = vrcp.f32 (!%p977_p10), %v658_v0 }
 0x358   : > { %v1145_v5 = vld [vmem:[%s1649_s16] sm:$0xff] (!%p977_p10)   ;;  %v1146_v7 = vld [vmem:[%s1649_s16 + $0x8] sm:$0xff] (!%p977_p10)  }
 0x359   : > { %1007 = vmatpush3.bf16.msra.mxu0 (!%p977_p10), %v1145_v5 }
 0x35a   : > { %1008 = vmatprep.subr.bf16.mxu0 %v1298_v6 }
 0x35b   : > { %v978_v30 = vld [vmem:[%s1650_s5] ss:$0 sm:$0xff] }
 0x35d   : > { %v1148_v1 = vpop.eup %1147  ;;  %1009 = vmatpush3.bf16.msra.mxu0 %v1146_v7 }
 0x35e   : > { %v1150_v2 = vpop.eup %1149  ;;  %675 = vperm.xlu0 %1143, %v1148_v1  }
 0x35f   : > { %v1152_v3 = vpop.eup %1151  ;;  %699 = vperm.xlu1 %1144, %v1150_v2  }
 0x360   : > { %v1154_v4 = vpop.eup %1153 }
 0x362   : > { %687 = vperm.xlu0 %1143, %v1152_v3  }
 0x363   : > { %663 = vperm.xlu1 %1144, %v1154_v4  }
 0x3dd   : > { %v676_v10 = vpop.permute.xlu0 %675 }
 0x3de   : > { %v678_v11 = vmul.f32 %v676_v10, %v672_v8  ;;  %v700_v12 = vpop.permute.xlu1 %699 }
 0x3df   : > { %v702_v13 = vmul.f32 %v700_v12, %v696_v9 }
 0x3e0   : > { %v679_v15 = vpack.c.bf16 %v678_v11, %v678_v11 }
 0x3e1   : > { %v688_v16 = vpop.permute.xlu0 %687  ;;  %v703_v17 = vpack.c.bf16 %v702_v13, %v702_v13 }
 0x3e2   : > { %v690_v18 = vmul.f32 %v688_v16, %v684_v14  ;;  %705 = vrot.lane.b32.xlu0 %v679_v15, %s1300_s11  ;;  %v664_v21 = vpop.permute.xlu1 %663 }
 0x3e3   : > { %v666_v22 = vmul.f32 %v664_v21, %v660_v20 }
 0x3e4   : > { %v691_v19 = vpack.c.bf16 %v690_v18, %v690_v18 }
 0x3e5   : > { %v667_v24 = vpack.c.bf16 %v666_v22, %v666_v22 }
 0x3e6   : > { %708 = vrot.lane.b32.xlu1 %v691_v19, %s1301_s13  ;;  %711 = vrot.lane.b32.xlu0 %v703_v17, %s1302_s19 }
 0x454   : > { %v706_v23 = vpop.permute.xlu0 %705 }
 0x455   : > { %v716_v25 = vsel %vm713_vm8, %v667_v24, %v706_v23 }
 0x458   : > { %v709_v26 = vpop.permute.xlu1 %708  ;;  %v712_v27 = vpop.permute.xlu0 %711 }
 0x459   : > { %v719_v28 = vsel %vm717_vm9, %v716_v25, %v709_v26 }
 0x45a   : > { %v722_v29 = vsel %vm720_vm10, %v719_v28, %v712_v27 }
 0x45b   : > { %1011 = vmatmul.mubr.msk.bf16.vlgmr.msra.gmra.mrb[0].mxu0 %vm746_vm11, %v722_v29 }
 0x52e   : > { %v783_v31 = vpop.f32.mrb[0].mxu0 }
 0x52f   : > { %v784_v32 = vadd.f32 %v978_v30, %v783_v31  ;;  %v1012_v33 = vpop.f32.mrb[1].mxu0 }
 0x530   : > { %v786_v34 = vpop.f32.mrb[2].mxu0 }
 0x531   : > { %789 = vst.msk [vmem:[%s1500_s25] sm:$0xff] %vm746_vm11, %v784_v32  ;;  %v1013_v35 = vpop.f32.mrb[3].mxu0 }
 0x532 PF: > { %s1651_s15 = sld [smem:[#allocation12_spill]]  ;;  %s1652_s30 = sld [smem:[#allocation11_spill]] }
 0x533   : > { %s806_s12 = sshll.u32 %s1500_s25, 4  ;;  %s1653_s19 = sld [smem:[#allocation19_spill]]  ;;  %s1558_s12 = int_to_ptr.vmem [resolvable:$true] %s806_s12 }
 0x534   : > { %s791_s5 = scalar_lea.sflag [#allocation9], %s1489_s14  ;;  %s1155_s0 = scalar_lea.vmem %s1558_s12, 128 }
 0x535   : > { %p1156_p11 = scmp.ne.s32.totalorder %s1558_s12, %s1155_s0  ;;  %s1303_s1 = smov [#allocation8]  }
 0x537   : > { %p1157_p12 = pnand %p1156_p11, %p1443_p13 }
 0x538   : > { %s983_s23 = sshll.u32 %s1651_s15, 1  ;;  %s1159_s15 = sshll.u32 %s1303_s1, 4  ;;  %s1160_s15 = int_to_ptr.vmem [resolvable:$false] %s1159_s15 }
 0x539   : > { %s802_s24 = sadd.s32 %s1652_s30, %s983_s23  ;;  %s1654_s6 = smov %s1653_s19 }
 0x53a   : > { %s984_s17 = sshll.u32 %s802_s24, 7  ;;  %p1158_p0 = pneg %p1157_p12 }
 0x53b   : > { %s804_s10 = scalar_lea.hbm %s1653_s19, %s984_s17  ;;  %s1161_s25 = scalar_lea.vmem %s1160_s15, 256 }
 0x53c   : > { %p1162_p2 = scmp.lt.s32.totalorder %s1558_s12, %s1160_s15  ;;  %p1163_p4 = scmp.lt.s32.totalorder %s1161_s25, %s1155_s0 }
 0x53e   : > { %p1164_p1 = por %p1163_p4, %p1162_p2 }
 0x540   : > { %p1165_p5 = pnand %p1164_p1, %p1158_p0 }
 0x542   : > { %1168 = shalt.err (!%p1165_p5)
}
 0x543   : > { %s1169_s30 = scalar_lea.hbm %s804_s10, 128  ;;  %s1173_s24 = scalar_lea.hbm %s1654_s6, 512 }
 0x544   : > { %p1170_p6 = scmp.ne.s32.totalorder %s804_s10, %s1169_s30  ;;  %p1174_p9 = scmp.lt.u32.totalorder %s804_s10, %s1654_s6 }
 0x545   : > { %p1175_p10 = scmp.lt.u32.totalorder %s1173_s24, %s1169_s30  ;;  %p1177_p12 = scmp.lt.u32.totalorder %s1169_s30, %s804_s10 }
 0x546   : > { %p1171_p7 = pnand %p1170_p6, %p1443_p13 }
 0x547   : > { %p1176_p11 = por %p1175_p10, %p1174_p9 }
 0x548   : > { %p1172_p8 = pneg %p1171_p7 }
 0x549   : > { %p1178_p2 = por %p1177_p12, %p1176_p11 }
 0x54b   : > { %p1179_p0 = pnand %p1178_p2, %p1172_p8 }
 0x54d   : > { %1182 = shalt.err (!%p1179_p0)
}
 0x54e   : > { %1014 = dma.vmem_to_hbm [thread:$0]  (%p1443_p13), %s1558_s12, 128, %s804_s10, %s791_s5  }
 0x54f PF: > { %p1020_p4 = scmp.ge.s32.totalorder %s1285_s29, 2  ;;  %s818_s0 = sand.u32 1, %s1241_s18  }
 0x550   : > { %s819_s1 = scalar_lea.sflag [#allocation9], %s818_s0 }
 0x551   : > { %p1017_p1 = pnand %p1020_p4, %p1457_p3 }
 0x553   : > { %1236 = dma.done.wait (!%p1017_p1), %s819_s1, 128  }
 0x554   : > { %1238 = vsyncadd (!%p1017_p1), %s819_s1, 4294967168  ;;  %s18_s29 = sadd.s32 1, %s1285_s29   ;;  %s1655_s23 = sld [smem:[#allocation13_spill]] }
 0x555   : > { %p15_p5 = scmp.ge.s32.totalorder %s18_s29, 10   ;;  %s1656_s4 = sld [smem:[#allocation14_spill]] }
 0x556   : > { %s1657_s18 = smov %s1253_s21  ;;  %s1658_s19 = smov %s1249_s20 }
 0x557   : > { %s1659_s20 = smov %s1451_s26  ;;  %s1660_s21 = smov %s1257_s22 }
 0x558   : > { %s1661_s22 = smov %s1448_s3  ;;  %s1662_s24 = smov %s1277_s27 }
 0x559   : > { %s1663_s25 = smov %s1281_s28  ;;  %s1664_s26 = smov %s1668_s7 }
 0x55a   : > { %s1665_s27 = smov %s1672_s8  ;;  %17 = sbr.rel (!%p15_p5) target bundleno = 13 (0xd), region = 261 }
 0x55b   : > { %s1666_s28 = smov %s1656_s4 }
 0x561   :  { %824 = vsyncpa [#allocation9], 1 }
 0x562   :  { %826 = vsyncpa [#allocation9 + $0x1], 1 }

</bundles_post_ra>
